<compile_context>
chip_gen: v5e
topology: v5e:2x2
jax: 0.10.0
libtpu: 0.0.40
codegen_flags: <defaults>
</compile_context>

<pallas_src>
import math

import jax
import jax.numpy as jnp
from jax.experimental import pallas as pl
from jax.experimental.pallas import tpu as pltpu


# ----------------------------- kernel ----------------------------------------

def _make_mha_kernel(n_head, d_k, d_v, has_bias, kv_same, return_attn):
    f32, bf16 = jnp.float32, jnp.bfloat16
    eps = 1e-6
    hk = n_head * d_k
    hv = n_head * d_v

    def kernel(*refs):
        it = iter(refs)
        q_ref = next(it)                       # (1, TQ, D)   fp32
        k_ref = next(it)                       # (1, LK, D)   bf16
        v_ref = None if kv_same else next(it)  # (1, LK, D)   bf16
        bias_ref = next(it) if has_bias else None   # (1, TQ, LK) bf16
        wq_ref = next(it)                      # (D, H*dk)    bf16 (pre-scaled 1/sqrt(dk))
        wkv_ref = next(it)                     # (D, H*(dk+dv)) bf16
        wo_ref = next(it)                      # (H*dv, D)    bf16
        bo_ref = next(it)                      # (1, D)       fp32
        lnw_ref = next(it)                     # (1, D)       fp32
        lnb_ref = next(it)                     # (1, D)       fp32
        out_ref = next(it)                     # (1, TQ, D)   fp32
        attn_ref = next(it) if return_attn else None  # (1, H, TQ, LK) bf16
        k_scratch = next(it)                   # (LK, H*dk)   bf16 VMEM
        v_scratch = next(it)                   # (LK, H*dv)   bf16 VMEM

        qi = pl.program_id(1)

        # ---- K/V projections: once per batch (query-block axis is the inner,
        #      "arbitrary" grid axis), one wide MXU matmul, kept in VMEM ------
        @pl.when(qi == 0)
        def _():
            kin = k_ref[0]                                        # (LK, D) bf16
            if kv_same:
                kv2d = jnp.dot(kin, wkv_ref[...],
                               preferred_element_type=f32)        # (LK, hk+hv)
                k_scratch[...] = kv2d[:, :hk].astype(bf16)
                v_scratch[...] = kv2d[:, hk:].astype(bf16)
            else:
                vin = v_ref[0]
                k_scratch[...] = jnp.dot(kin, wkv_ref[:, :hk],
                                         preferred_element_type=f32).astype(bf16)
                v_scratch[...] = jnp.dot(vin, wkv_ref[:, hk:],
                                         preferred_element_type=f32).astype(bf16)

        x = q_ref[0]                                              # (TQ, D) fp32

        # ---- pre-LayerNorm on the queries (fp32; rsqrt -> EUP) --------------
        mu = jnp.mean(x, axis=-1, keepdims=True)
        var = jnp.mean(jnp.square(x - mu), axis=-1, keepdims=True)
        xn = (x - mu) * jax.lax.rsqrt(var + eps) * lnw_ref[...] + lnb_ref[...]

        # ---- Q projection: single (TQ, D) x (D, H*dk) matmul ----------------
        qh2d = jnp.dot(xn.astype(bf16), wq_ref[...],
                       preferred_element_type=f32)                # (TQ, H*dk)

        # ---- split heads (static lane slices -> leading-batch 3-D) ----------
        k_all = k_scratch[...]                                    # (LK, H*dk) bf16
        v_all = v_scratch[...]                                    # (LK, H*dv) bf16
        qh = jnp.stack([qh2d[:, h * d_k:(h + 1) * d_k]
                        for h in range(n_head)], axis=0).astype(bf16)   # (H, TQ, dk)
        kh = jnp.stack([k_all[:, h * d_k:(h + 1) * d_k]
                        for h in range(n_head)], axis=0)                # (H, LK, dk)
        vh = jnp.stack([v_all[:, h * d_v:(h + 1) * d_v]
                        for h in range(n_head)], axis=0)                # (H, LK, dv)

        # ---- scaled dot-product attention, batched over heads ---------------
        scores = jnp.einsum('hqd,hkd->hqk', qh, kh,
                            preferred_element_type=f32)           # (H, TQ, LK)
        if has_bias:
            scores = scores + bias_ref[0].astype(f32)[None, :, :]

        m = jnp.max(scores, axis=-1, keepdims=True)
        e = jnp.exp(scores - m)
        denom = jnp.sum(e, axis=-1, keepdims=True)
        attn = e * pl.reciprocal(denom, approx=True)              # (H, TQ, LK) f32

        if return_attn:
            attn_ref[0] = attn.astype(attn_ref.dtype)

        ctx = jnp.einsum('hqk,hkd->hqd', attn.astype(bf16), vh,
                         preferred_element_type=f32)              # (H, TQ, dv)

        # ---- output projection: concat heads along lanes, single matmul -----
        #      (head reduction folded into the MXU contraction, K = H*dv)
        ctx2d = jnp.concatenate([ctx[h] for h in range(n_head)], axis=-1)  # (TQ, H*dv)
        o = jnp.dot(ctx2d.astype(bf16), wo_ref[...],
                    preferred_element_type=f32)                   # (TQ, D)
        out_ref[0] = (o + bo_ref[...] + x).astype(out_ref.dtype)  # + residual

    return kernel


# ----------------------------- wrapper ----------------------------------------

def _prep_weights(params, n_head, d_k, d_v):
    """Transpose / pre-scale / bf16-cast projection weights (done once, in XLA)."""
    bf16 = jnp.bfloat16
    wq2d = (params['wq'].T / math.sqrt(d_k)).astype(bf16)     # (D, H*dk), pre-scaled
    wk2d = params['wk'].T.astype(bf16)                        # (D, H*dk)
    wv2d = params['wv'].T.astype(bf16)                        # (D, H*dv)
    wkv2d = jnp.concatenate([wk2d, wv2d], axis=1)             # (D, H*(dk+dv))
    wo2d = params['wfc'].T.astype(bf16)                       # (H*dv, D)
    return wq2d, wkv2d, wo2d


def multi_head_attention(q, k, v, mask, params, *, n_head, d_k, d_v,
                         block_q=None, return_attn=False):
    B, Lq, D = q.shape
    Lk = k.shape[1]
    assert v.shape[1] == Lk
    hk, hv = n_head * d_k, n_head * d_v

    kv_same = k is v
    has_bias = mask is not None

    if block_q is None:
        # 256-row tiles fill the 2x256 MXU on v6e/v7x; 128 is enough on v5e.
        if Lq <= 256:
            block_q = Lq
        elif Lq % 256 == 0:
            block_q = 256
        elif Lq % 128 == 0:
            block_q = 128
        else:
            block_q = Lq
    assert Lq % block_q == 0, "query length must be a multiple of block_q"
    nq = Lq // block_q

    wq2d, wkv2d, wo2d = _prep_weights(params, n_head, d_k, d_v)

    # the kernel only ever consumes k/v as bf16 -> cast in the wrapper
    k_bf = k.astype(jnp.bfloat16)
    v_bf = None if kv_same else v.astype(jnp.bfloat16)

    vmem = pl.BlockSpec(memory_space=pltpu.MemorySpace.VMEM)
    inputs = [q, k_bf]
    in_specs = [
        pl.BlockSpec((1, block_q, D), lambda b, qi: (b, qi, 0)),    # q
        pl.BlockSpec((1, Lk, D), lambda b, qi: (b, 0, 0)),          # k (bf16)
    ]
    if not kv_same:
        inputs.append(v_bf)
        in_specs.append(pl.BlockSpec((1, Lk, D), lambda b, qi: (b, 0, 0)))
    if has_bias:
        mask_b = jnp.broadcast_to(mask, (B, Lq, Lk))
        bias = jnp.where(mask_b, -1e9, 0.0).astype(jnp.bfloat16)
        inputs.append(bias)
        in_specs.append(pl.BlockSpec((1, block_q, Lk), lambda b, qi: (b, qi, 0)))
    inputs += [wq2d, wkv2d, wo2d, params['bfc'], params['ln_w'], params['ln_b']]
    in_specs += [vmem] * 6          # whole-array VMEM residents (weights / biases)

    out_shape = [jax.ShapeDtypeStruct((B, Lq, D), jnp.float32)]
    out_specs = [pl.BlockSpec((1, block_q, D), lambda b, qi: (b, qi, 0))]
    if return_attn:
        out_shape.append(jax.ShapeDtypeStruct((B, n_head, Lq, Lk), jnp.bfloat16))
        out_specs.append(pl.BlockSpec((1, n_head, block_q, Lk),
                                      lambda b, qi: (b, 0, qi, 0)))

    kernel = _make_mha_kernel(n_head, d_k, d_v, has_bias, kv_same, return_attn)

    # advisory cost estimate so XLA schedules around the kernel sensibly
    flops = int(2 * B * (Lq * D * hk + Lk * D * (hk + hv)
                         + Lq * Lk * (hk + hv) + Lq * hv * D))
    bytes_accessed = int(
        q.size * 4 + k_bf.size * 2
        + (0 if kv_same else v_bf.size * 2)
        + (B * Lq * Lk * 2 if has_bias else 0)
        + (wq2d.size + wkv2d.size + wo2d.size) * 2
        + B * Lq * D * 4
        + (B * n_head * Lq * Lk * 2 if return_attn else 0))
    cost = pl.CostEstimate(flops=flops,
                           transcendentals=int(B * n_head * Lq * Lk),
                           bytes_accessed=bytes_accessed)

    f = pl.pallas_call(
        kernel,
        out_shape=tuple(out_shape),
        grid_spec=pltpu.PrefetchScalarGridSpec(
            num_scalar_prefetch=0,
            grid=(B, nq),
            in_specs=in_specs,
            out_specs=tuple(out_specs),
            scratch_shapes=[pltpu.VMEM((Lk, hk), jnp.bfloat16),   # projected K
                            pltpu.VMEM((Lk, hv), jnp.bfloat16)],  # projected V
        ),
        compiler_params=pltpu.CompilerParams(
            # batch axis feeds both TensorCores; the query-block axis must stay
            # sequential because K/V scratch is filled at qi == 0 and reused.
            dimension_semantics=("parallel", "arbitrary"),
            vmem_limit_bytes=48 * 1024 * 1024,
        ),
        cost_estimate=cost,
    )
    outs = f(*inputs)
    out = outs[0]
    attn = outs[1] if return_attn else None
    return out, attn


# --------------------------- pure-JAX reference -------------------------------
# Mirrors the kernel's bf16 matmul casts so the comparison is tight; with the
# casts removed this is exactly the PyTorch MultiHeadAttention forward
# (normalize_before=True, eval mode).

def mha_reference(q, k, v, mask, params, *, n_head, d_k, d_v):
    f32, bf16 = jnp.float32, jnp.bfloat16
    eps = 1e-6
    B, Lq, D = q.shape
    Lk = k.shape[1]
    hk, hv = n_head * d_k, n_head * d_v
    wq2d, wkv2d, wo2d = _prep_weights(params, n_head, d_k, d_v)

    mu = jnp.mean(q, axis=-1, keepdims=True)
    var = jnp.mean(jnp.square(q - mu), axis=-1, keepdims=True)
    xn = (q - mu) / jnp.sqrt(var + eps) * params['ln_w'] + params['ln_b']

    qh2d = jnp.einsum('bqm,mf->bqf', xn.astype(bf16), wq2d, preferred_element_type=f32)
    kh2d = jnp.einsum('bkm,mf->bkf', k.astype(bf16), wkv2d[:, :hk],
                      preferred_element_type=f32).astype(bf16)
    vh2d = jnp.einsum('bkm,mf->bkf', v.astype(bf16), wkv2d[:, hk:],
                      preferred_element_type=f32).astype(bf16)

    qh = qh2d.reshape(B, Lq, n_head, d_k).transpose(0, 2, 1, 3).astype(bf16)
    kh = kh2d.reshape(B, Lk, n_head, d_k).transpose(0, 2, 1, 3)
    vh = vh2d.reshape(B, Lk, n_head, d_v).transpose(0, 2, 1, 3)

    scores = jnp.einsum('bhqd,bhkd->bhqk', qh, kh, preferred_element_type=f32)
    if mask is not None:
        bias = jnp.where(jnp.broadcast_to(mask, (B, Lq, Lk)), -1e9, 0.0).astype(bf16)
        scores = scores + bias[:, None].astype(f32)
    attn = jax.nn.softmax(scores, axis=-1)

    ctx = jnp.einsum('bhqk,bhkd->bhqd', attn.astype(bf16), vh,
                     preferred_element_type=f32)
    ctx2d = ctx.transpose(0, 2, 1, 3).reshape(B, Lq, hv)
    out = jnp.einsum('bqf,fm->bqm', ctx2d.astype(bf16), wo2d,
                     preferred_element_type=f32) + params['bfc']
    out = out + q
    return out, attn


# ------------------------------- main ------------------------------------------

if __name__ == "__main__":
    B, L = 2, 8
    d_model = 32
    n_head, d_k, d_v = 4, 8, 8

    key = jax.random.PRNGKey(0)
    ks = jax.random.split(key, 8)

    def xavier(k, shape):
        fan_out, fan_in = shape
        bound = (6.0 / (fan_in + fan_out)) ** 0.5
        return jax.random.uniform(k, shape, jnp.float32, -bound, bound)

    params = {
        "wq": xavier(ks[0], (n_head * d_k, d_model)),
        "wk": xavier(ks[1], (n_head * d_k, d_model)),
        "wv": xavier(ks[2], (n_head * d_v, d_model)),
        "wfc": xavier(ks[3], (d_model, n_head * d_v)),
        "bfc": jax.random.normal(ks[4], (1, d_model), jnp.float32) * 0.02,
        "ln_w": 1.0 + 0.1 * jax.random.normal(ks[5], (1, d_model), jnp.float32),
        "ln_b": 0.02 * jax.random.normal(ks[6], (1, d_model), jnp.float32),
    }

    x = jax.random.normal(ks[7], (B, L, d_model), jnp.float32)
    # causal (subsequent-position) attention mask: True where masked
    causal = jnp.triu(jnp.ones((L, L), dtype=jnp.bool_), k=1)
    mask = jnp.broadcast_to(causal, (B, L, L))

    out, attn = multi_head_attention(x, x, x, mask, params,
                                     n_head=n_head, d_k=d_k, d_v=d_v,
                                     return_attn=True)
    jax.block_until_ready((out, attn))

    out_r, attn_r = mha_reference(x, x, x, mask, params,
                                  n_head=n_head, d_k=d_k, d_v=d_v)

    assert out.shape == (B, L, d_model)
    assert attn.shape == (B, n_head, L, L)
    attn_f32 = attn.astype(jnp.float32)
    assert jnp.allclose(attn_f32, attn_r, atol=1e-2, rtol=2e-2), \
        f"attn mismatch: {jnp.max(jnp.abs(attn_f32 - attn_r))}"
    assert jnp.allclose(out, out_r, atol=1e-2, rtol=1e-2), \
        f"output mismatch: {jnp.max(jnp.abs(out - out_r))}"

    print("KERNEL_OK")
</pallas_src>

<mosaic_0001>
module attributes {stable_mosaic.version = 11 : i64} {
  func.func @kernel(%arg0: i32, %arg1: i32, %arg2: memref<1x8x32xf32, #tpu.memory_space<vmem>>, %arg3: memref<1x8x32xbf16, #tpu.memory_space<vmem>>, %arg4: memref<1x8x8xbf16, #tpu.memory_space<vmem>>, %arg5: memref<32x32xbf16, #tpu.memory_space<vmem>>, %arg6: memref<32x64xbf16, #tpu.memory_space<vmem>>, %arg7: memref<32x32xbf16, #tpu.memory_space<vmem>>, %arg8: memref<1x32xf32, #tpu.memory_space<vmem>>, %arg9: memref<1x32xf32, #tpu.memory_space<vmem>>, %arg10: memref<1x32xf32, #tpu.memory_space<vmem>>, %arg11: memref<1x8x32xf32, #tpu.memory_space<vmem>>, %arg12: memref<1x4x8x8xbf16, #tpu.memory_space<vmem>>, %arg13: memref<8x32xbf16, #tpu.memory_space<vmem>>, %arg14: memref<8x32xbf16, #tpu.memory_space<vmem>>) attributes {dimension_semantics = [#tpu.dimension_semantics<parallel>, #tpu.dimension_semantics<arbitrary>], iteration_bounds = array<i64: 2, 1>, scalar_prefetch = 0 : i64, scratch_operands = 2 : i64, tpu.core_type = #tpu.core_type<tc>, window_params = [{transform_indices = @transform_0, window_bounds = array<i64: 1, 8, 32>}, {transform_indices = @transform_1, window_bounds = array<i64: 1, 8, 32>}, {transform_indices = @transform_2, window_bounds = array<i64: 1, 8, 8>}, {pipeline_mode = #tpu.pipeline_mode<synchronous>, transform_indices = @transform_3, window_bounds = array<i64: 32, 32>}, {pipeline_mode = #tpu.pipeline_mode<synchronous>, transform_indices = @transform_4, window_bounds = array<i64: 32, 64>}, {pipeline_mode = #tpu.pipeline_mode<synchronous>, transform_indices = @transform_5, window_bounds = array<i64: 32, 32>}, {pipeline_mode = #tpu.pipeline_mode<synchronous>, transform_indices = @transform_6, window_bounds = array<i64: 1, 32>}, {pipeline_mode = #tpu.pipeline_mode<synchronous>, transform_indices = @transform_7, window_bounds = array<i64: 1, 32>}, {pipeline_mode = #tpu.pipeline_mode<synchronous>, transform_indices = @transform_8, window_bounds = array<i64: 1, 32>}, {transform_indices = @transform_9, window_bounds = array<i64: 1, 8, 32>}, {transform_indices = @transform_10, window_bounds = array<i64: 1, 4, 8, 8>}]} {
    %c0_i32 = arith.constant 0 : i32
    %0 = arith.cmpi eq, %arg1, %c0_i32 : i32
    %1 = arith.extui %0 : i1 to i32
    %c0_i32_0 = arith.constant 0 : i32
    %2 = arith.cmpi ne, %1, %c0_i32_0 : i32
    scf.if %2 {
      %c0_37 = arith.constant 0 : index
      %c0_38 = arith.constant 0 : index
      %c0_39 = arith.constant 0 : index
      %104 = vector.load %arg3[%c0_37, %c0_38, %c0_39] : memref<1x8x32xbf16, #tpu.memory_space<vmem>>, vector<1x8x32xbf16>
      %105 = vector.shape_cast %104 : vector<1x8x32xbf16> to vector<8x32xbf16>
      %c0_40 = arith.constant 0 : index
      %c0_41 = arith.constant 0 : index
      %106 = vector.load %arg6[%c0_40, %c0_41] : memref<32x64xbf16, #tpu.memory_space<vmem>>, vector<32x64xbf16>
      %cst_42 = arith.constant dense<0.000000e+00> : vector<8x64xf32>
      %107 = tpu.matmul %105, %106, %cst_42 {dimension_numbers = #tpu.dot_dimension_numbers<[1], [0], [0], [1], [0, 0, 1, 1], [], []>} : vector<8x32xbf16>, vector<32x64xbf16>, vector<8x64xf32> -> vector<8x64xf32>
      %108 = vector.extract_strided_slice %107 {offsets = [0, 0], sizes = [8, 32], strides = [1, 1]} : vector<8x64xf32> to vector<8x32xf32>
      %109 = arith.truncf %108 : vector<8x32xf32> to vector<8x32xbf16>
      %c0_43 = arith.constant 0 : index
      %c0_44 = arith.constant 0 : index
      %110 = vector.load %arg13[%c0_43, %c0_44] : memref<8x32xbf16, #tpu.memory_space<vmem>>, vector<8x32xbf16>
      tpu.vector_store %arg13[%c0_43, %c0_44], %109 {strides = array<i32>} : memref<8x32xbf16, #tpu.memory_space<vmem>>, vector<8x32xbf16>,
      %111 = vector.extract_strided_slice %107 {offsets = [0, 32], sizes = [8, 32], strides = [1, 1]} : vector<8x64xf32> to vector<8x32xf32>
      %112 = arith.truncf %111 : vector<8x32xf32> to vector<8x32xbf16>
      %c0_45 = arith.constant 0 : index
      %c0_46 = arith.constant 0 : index
      %113 = vector.load %arg14[%c0_45, %c0_46] : memref<8x32xbf16, #tpu.memory_space<vmem>>, vector<8x32xbf16>
      tpu.vector_store %arg14[%c0_45, %c0_46], %112 {strides = array<i32>} : memref<8x32xbf16, #tpu.memory_space<vmem>>, vector<8x32xbf16>,
    } else {
    }
    %c0 = arith.constant 0 : index
    %c0_1 = arith.constant 0 : index
    %c0_2 = arith.constant 0 : index
    %3 = vector.load %arg2[%c0, %c0_1, %c0_2] : memref<1x8x32xf32, #tpu.memory_space<vmem>>, vector<1x8x32xf32>
    %4 = vector.shape_cast %3 : vector<1x8x32xf32> to vector<8x32xf32>
    %cst = arith.constant dense<0.000000e+00> : vector<8xf32>
    %5 = vector.multi_reduction <add>, %4, %cst [1] : vector<8x32xf32> to vector<8xf32>
    %6 = vector.shape_cast %5 : vector<8xf32> to vector<8x1xf32>
    %cst_3 = arith.constant 3.200000e+01 : f32
    %7 = vector.broadcast %cst_3 : f32 to vector<8x1xf32>
    %8 = arith.divf %6, %7 : vector<8x1xf32>
    %9 = vector.broadcast %8 : vector<8x1xf32> to vector<8x32xf32>
    %10 = arith.subf %4, %9 : vector<8x32xf32>
    %11 = arith.mulf %10, %10 : vector<8x32xf32>
    %cst_4 = arith.constant dense<0.000000e+00> : vector<8xf32>
    %12 = vector.multi_reduction <add>, %11, %cst_4 [1] : vector<8x32xf32> to vector<8xf32>
    %13 = vector.shape_cast %12 : vector<8xf32> to vector<8x1xf32>
    %cst_5 = arith.constant 3.200000e+01 : f32
    %14 = vector.broadcast %cst_5 : f32 to vector<8x1xf32>
    %15 = arith.divf %13, %14 : vector<8x1xf32>
    %16 = vector.broadcast %8 : vector<8x1xf32> to vector<8x32xf32>
    %17 = arith.subf %4, %16 : vector<8x32xf32>
    %cst_6 = arith.constant 9.99999997E-7 : f32
    %18 = vector.broadcast %cst_6 : f32 to vector<8x1xf32>
    %19 = arith.addf %15, %18 : vector<8x1xf32>
    %20 = math.rsqrt %19 : vector<8x1xf32>
    %21 = vector.broadcast %20 : vector<8x1xf32> to vector<8x32xf32>
    %22 = arith.mulf %17, %21 : vector<8x32xf32>
    %c0_7 = arith.constant 0 : index
    %c0_8 = arith.constant 0 : index
    %23 = vector.load %arg9[%c0_7, %c0_8] : memref<1x32xf32, #tpu.memory_space<vmem>>, vector<1x32xf32>
    %24 = vector.broadcast %23 : vector<1x32xf32> to vector<8x32xf32>
    %25 = arith.mulf %22, %24 : vector<8x32xf32>
    %c0_9 = arith.constant 0 : index
    %c0_10 = arith.constant 0 : index
    %26 = vector.load %arg10[%c0_9, %c0_10] : memref<1x32xf32, #tpu.memory_space<vmem>>, vector<1x32xf32>
    %27 = vector.broadcast %26 : vector<1x32xf32> to vector<8x32xf32>
    %28 = arith.addf %25, %27 : vector<8x32xf32>
    %29 = arith.truncf %28 : vector<8x32xf32> to vector<8x32xbf16>
    %c0_11 = arith.constant 0 : index
    %c0_12 = arith.constant 0 : index
    %30 = vector.load %arg5[%c0_11, %c0_12] : memref<32x32xbf16, #tpu.memory_space<vmem>>, vector<32x32xbf16>
    %cst_13 = arith.constant dense<0.000000e+00> : vector<8x32xf32>
    %31 = tpu.matmul %29, %30, %cst_13 {dimension_numbers = #tpu.dot_dimension_numbers<[1], [0], [0], [1], [0, 0, 1, 1], [], []>} : vector<8x32xbf16>, vector<32x32xbf16>, vector<8x32xf32> -> vector<8x32xf32>
    %c0_14 = arith.constant 0 : index
    %c0_15 = arith.constant 0 : index
    %32 = vector.load %arg13[%c0_14, %c0_15] : memref<8x32xbf16, #tpu.memory_space<vmem>>, vector<8x32xbf16>
    %c0_16 = arith.constant 0 : index
    %c0_17 = arith.constant 0 : index
    %33 = vector.load %arg14[%c0_16, %c0_17] : memref<8x32xbf16, #tpu.memory_space<vmem>>, vector<8x32xbf16>
    %34 = vector.extract_strided_slice %31 {offsets = [0, 0], sizes = [8, 8], strides = [1, 1]} : vector<8x32xf32> to vector<8x8xf32>
    %35 = vector.extract_strided_slice %31 {offsets = [0, 8], sizes = [8, 8], strides = [1, 1]} : vector<8x32xf32> to vector<8x8xf32>
    %36 = vector.extract_strided_slice %31 {offsets = [0, 16], sizes = [8, 8], strides = [1, 1]} : vector<8x32xf32> to vector<8x8xf32>
    %37 = vector.extract_strided_slice %31 {offsets = [0, 24], sizes = [8, 8], strides = [1, 1]} : vector<8x32xf32> to vector<8x8xf32>
    %38 = vector.shape_cast %34 : vector<8x8xf32> to vector<1x8x8xf32>
    %39 = vector.shape_cast %35 : vector<8x8xf32> to vector<1x8x8xf32>
    %40 = vector.shape_cast %36 : vector<8x8xf32> to vector<1x8x8xf32>
    %41 = vector.shape_cast %37 : vector<8x8xf32> to vector<1x8x8xf32>
    %42 = tpu.concatenate %38, %39, %40, %41 in 0 : vector<1x8x8xf32>, vector<1x8x8xf32>, vector<1x8x8xf32>, vector<1x8x8xf32> -> vector<4x8x8xf32>
    %43 = arith.truncf %42 : vector<4x8x8xf32> to vector<4x8x8xbf16>
    %44 = vector.extract_strided_slice %32 {offsets = [0, 0], sizes = [8, 8], strides = [1, 1]} : vector<8x32xbf16> to vector<8x8xbf16>
    %45 = vector.extract_strided_slice %32 {offsets = [0, 8], sizes = [8, 8], strides = [1, 1]} : vector<8x32xbf16> to vector<8x8xbf16>
    %46 = vector.extract_strided_slice %32 {offsets = [0, 16], sizes = [8, 8], strides = [1, 1]} : vector<8x32xbf16> to vector<8x8xbf16>
    %47 = vector.extract_strided_slice %32 {offsets = [0, 24], sizes = [8, 8], strides = [1, 1]} : vector<8x32xbf16> to vector<8x8xbf16>
    %48 = vector.shape_cast %44 : vector<8x8xbf16> to vector<1x8x8xbf16>
    %49 = vector.shape_cast %45 : vector<8x8xbf16> to vector<1x8x8xbf16>
    %50 = vector.shape_cast %46 : vector<8x8xbf16> to vector<1x8x8xbf16>
    %51 = vector.shape_cast %47 : vector<8x8xbf16> to vector<1x8x8xbf16>
    %52 = tpu.concatenate %48, %49, %50, %51 in 0 : vector<1x8x8xbf16>, vector<1x8x8xbf16>, vector<1x8x8xbf16>, vector<1x8x8xbf16> -> vector<4x8x8xbf16>
    %53 = vector.extract_strided_slice %33 {offsets = [0, 0], sizes = [8, 8], strides = [1, 1]} : vector<8x32xbf16> to vector<8x8xbf16>
    %54 = vector.extract_strided_slice %33 {offsets = [0, 8], sizes = [8, 8], strides = [1, 1]} : vector<8x32xbf16> to vector<8x8xbf16>
    %55 = vector.extract_strided_slice %33 {offsets = [0, 16], sizes = [8, 8], strides = [1, 1]} : vector<8x32xbf16> to vector<8x8xbf16>
    %56 = vector.extract_strided_slice %33 {offsets = [0, 24], sizes = [8, 8], strides = [1, 1]} : vector<8x32xbf16> to vector<8x8xbf16>
    %57 = vector.shape_cast %53 : vector<8x8xbf16> to vector<1x8x8xbf16>
    %58 = vector.shape_cast %54 : vector<8x8xbf16> to vector<1x8x8xbf16>
    %59 = vector.shape_cast %55 : vector<8x8xbf16> to vector<1x8x8xbf16>
    %60 = vector.shape_cast %56 : vector<8x8xbf16> to vector<1x8x8xbf16>
    %61 = tpu.concatenate %57, %58, %59, %60 in 0 : vector<1x8x8xbf16>, vector<1x8x8xbf16>, vector<1x8x8xbf16>, vector<1x8x8xbf16> -> vector<4x8x8xbf16>
    "tpu.trace_start"() <{level = 10 : i32, message = "hqd,hkd->hqk"}> : () -> ()
    %cst_18 = arith.constant dense<0.000000e+00> : vector<4x8x8xf32>
    %62 = tpu.matmul %43, %52, %cst_18 {dimension_numbers = #tpu.dot_dimension_numbers<[2], [2], [1], [1], [0, 0, 0, 1, 1, 1], [0], [0]>} : vector<4x8x8xbf16>, vector<4x8x8xbf16>, vector<4x8x8xf32> -> vector<4x8x8xf32>
    "tpu.trace_stop"() : () -> ()
    %c0_19 = arith.constant 0 : index
    %c0_20 = arith.constant 0 : index
    %c0_21 = arith.constant 0 : index
    %63 = vector.load %arg4[%c0_19, %c0_20, %c0_21] : memref<1x8x8xbf16, #tpu.memory_space<vmem>>, vector<1x8x8xbf16>
    %64 = vector.shape_cast %63 : vector<1x8x8xbf16> to vector<8x8xbf16>
    %65 = arith.extf %64 : vector<8x8xbf16> to vector<8x8xf32>
    %66 = vector.shape_cast %65 : vector<8x8xf32> to vector<1x8x8xf32>
    %67 = vector.broadcast %66 : vector<1x8x8xf32> to vector<4x8x8xf32>
    %68 = arith.addf %62, %67 : vector<4x8x8xf32>
    %cst_22 = arith.constant dense<0xFF800000> : vector<4x8xf32>
    %69 = vector.multi_reduction <maximumf>, %68, %cst_22 [2] : vector<4x8x8xf32> to vector<4x8xf32>
    %70 = vector.shape_cast %69 : vector<4x8xf32> to vector<4x8x1xf32>
    %71 = vector.broadcast %70 : vector<4x8x1xf32> to vector<4x8x8xf32>
    %72 = arith.subf %68, %71 : vector<4x8x8xf32>
    %73 = math.exp %72 : vector<4x8x8xf32>
    %cst_23 = arith.constant dense<0.000000e+00> : vector<4x8xf32>
    %74 = vector.multi_reduction <add>, %73, %cst_23 [2] : vector<4x8x8xf32> to vector<4x8xf32>
    %75 = vector.shape_cast %74 : vector<4x8xf32> to vector<4x8x1xf32>
    %76 = tpu.reciprocal %75 {approx = true} : vector<4x8x1xf32> -> vector<4x8x1xf32>
    %77 = vector.broadcast %76 : vector<4x8x1xf32> to vector<4x8x8xf32>
    %78 = arith.mulf %73, %77 : vector<4x8x8xf32>
    %79 = arith.truncf %78 : vector<4x8x8xf32> to vector<4x8x8xbf16>
    %c0_24 = arith.constant 0 : index
    %c0_25 = arith.constant 0 : index
    %c0_26 = arith.constant 0 : index
    %c0_27 = arith.constant 0 : index
    %80 = vector.load %arg12[%c0_24, %c0_25, %c0_26, %c0_27] : memref<1x4x8x8xbf16, #tpu.memory_space<vmem>>, vector<1x4x8x8xbf16>
    %81 = vector.shape_cast %80 : vector<1x4x8x8xbf16> to vector<4x8x8xbf16>
    %82 = vector.shape_cast %79 : vector<4x8x8xbf16> to vector<1x4x8x8xbf16>
    tpu.vector_store %arg12[%c0_24, %c0_25, %c0_26, %c0_27], %82 {strides = array<i32>} : memref<1x4x8x8xbf16, #tpu.memory_space<vmem>>, vector<1x4x8x8xbf16>,
    %83 = arith.truncf %78 : vector<4x8x8xf32> to vector<4x8x8xbf16>
    "tpu.trace_start"() <{level = 10 : i32, message = "hqk,hkd->hqd"}> : () -> ()
    %cst_28 = arith.constant dense<0.000000e+00> : vector<4x8x8xf32>
    %84 = tpu.matmul %83, %61, %cst_28 {dimension_numbers = #tpu.dot_dimension_numbers<[2], [1], [1], [2], [0, 0, 0, 1, 1, 2], [0], [0]>} : vector<4x8x8xbf16>, vector<4x8x8xbf16>, vector<4x8x8xf32> -> vector<4x8x8xf32>
    "tpu.trace_stop"() : () -> ()
    %85 = vector.extract_strided_slice %84 {offsets = [0, 0, 0], sizes = [1, 8, 8], strides = [1, 1, 1]} : vector<4x8x8xf32> to vector<1x8x8xf32>
    %86 = vector.shape_cast %85 : vector<1x8x8xf32> to vector<8x8xf32>
    %87 = vector.extract_strided_slice %84 {offsets = [1, 0, 0], sizes = [1, 8, 8], strides = [1, 1, 1]} : vector<4x8x8xf32> to vector<1x8x8xf32>
    %88 = vector.shape_cast %87 : vector<1x8x8xf32> to vector<8x8xf32>
    %89 = vector.extract_strided_slice %84 {offsets = [2, 0, 0], sizes = [1, 8, 8], strides = [1, 1, 1]} : vector<4x8x8xf32> to vector<1x8x8xf32>
    %90 = vector.shape_cast %89 : vector<1x8x8xf32> to vector<8x8xf32>
    %91 = vector.extract_strided_slice %84 {offsets = [3, 0, 0], sizes = [1, 8, 8], strides = [1, 1, 1]} : vector<4x8x8xf32> to vector<1x8x8xf32>
    %92 = vector.shape_cast %91 : vector<1x8x8xf32> to vector<8x8xf32>
    %93 = tpu.concatenate %86, %88, %90, %92 in 1 : vector<8x8xf32>, vector<8x8xf32>, vector<8x8xf32>, vector<8x8xf32> -> vector<8x32xf32>
    %94 = arith.truncf %93 : vector<8x32xf32> to vector<8x32xbf16>
    %c0_29 = arith.constant 0 : index
    %c0_30 = arith.constant 0 : index
    %95 = vector.load %arg7[%c0_29, %c0_30] : memref<32x32xbf16, #tpu.memory_space<vmem>>, vector<32x32xbf16>
    %cst_31 = arith.constant dense<0.000000e+00> : vector<8x32xf32>
    %96 = tpu.matmul %94, %95, %cst_31 {dimension_numbers = #tpu.dot_dimension_numbers<[1], [0], [0], [1], [0, 0, 1, 1], [], []>} : vector<8x32xbf16>, vector<32x32xbf16>, vector<8x32xf32> -> vector<8x32xf32>
    %c0_32 = arith.constant 0 : index
    %c0_33 = arith.constant 0 : index
    %97 = vector.load %arg8[%c0_32, %c0_33] : memref<1x32xf32, #tpu.memory_space<vmem>>, vector<1x32xf32>
    %98 = vector.broadcast %97 : vector<1x32xf32> to vector<8x32xf32>
    %99 = arith.addf %96, %98 : vector<8x32xf32>
    %100 = arith.addf %99, %4 : vector<8x32xf32>
    %c0_34 = arith.constant 0 : index
    %c0_35 = arith.constant 0 : index
    %c0_36 = arith.constant 0 : index
    %101 = vector.load %arg11[%c0_34, %c0_35, %c0_36] : memref<1x8x32xf32, #tpu.memory_space<vmem>>, vector<1x8x32xf32>
    %102 = vector.shape_cast %101 : vector<1x8x32xf32> to vector<8x32xf32>
    %103 = vector.shape_cast %100 : vector<8x32xf32> to vector<1x8x32xf32>
    tpu.vector_store %arg11[%c0_34, %c0_35, %c0_36], %103 {strides = array<i32>} : memref<1x8x32xf32, #tpu.memory_space<vmem>>, vector<1x8x32xf32>,
    return
  }
  func.func @transform_0(%arg0: i32, %arg1: i32) -> (i32, i32, i32) {
    %c0_i32 = arith.constant 0 : i32
    %c0_i32_0 = arith.constant 0 : i32
    return %arg0, %arg1, %c0_i32 : i32, i32, i32
  }
  func.func @transform_1(%arg0: i32, %arg1: i32) -> (i32, i32, i32) {
    %c0_i32 = arith.constant 0 : i32
    %c0_i32_0 = arith.constant 0 : i32
    %c0_i32_1 = arith.constant 0 : i32
    return %arg0, %c0_i32, %c0_i32_0 : i32, i32, i32
  }
  func.func @transform_2(%arg0: i32, %arg1: i32) -> (i32, i32, i32) {
    %c0_i32 = arith.constant 0 : i32
    %c0_i32_0 = arith.constant 0 : i32
    return %arg0, %arg1, %c0_i32 : i32, i32, i32
  }
  func.func @transform_3(%arg0: i32, %arg1: i32) -> (i32, i32) {
    %c0_i32 = arith.constant 0 : i32
    %c0_i32_0 = arith.constant 0 : i32
    %c0_i32_1 = arith.constant 0 : i32
    return %c0_i32, %c0_i32_0 : i32, i32
  }
  func.func @transform_4(%arg0: i32, %arg1: i32) -> (i32, i32) {
    %c0_i32 = arith.constant 0 : i32
    %c0_i32_0 = arith.constant 0 : i32
    %c0_i32_1 = arith.constant 0 : i32
    return %c0_i32, %c0_i32_0 : i32, i32
  }
  func.func @transform_5(%arg0: i32, %arg1: i32) -> (i32, i32) {
    %c0_i32 = arith.constant 0 : i32
    %c0_i32_0 = arith.constant 0 : i32
    %c0_i32_1 = arith.constant 0 : i32
    return %c0_i32, %c0_i32_0 : i32, i32
  }
  func.func @transform_6(%arg0: i32, %arg1: i32) -> (i32, i32) {
    %c0_i32 = arith.constant 0 : i32
    %c0_i32_0 = arith.constant 0 : i32
    %c0_i32_1 = arith.constant 0 : i32
    return %c0_i32, %c0_i32_0 : i32, i32
  }
  func.func @transform_7(%arg0: i32, %arg1: i32) -> (i32, i32) {
    %c0_i32 = arith.constant 0 : i32
    %c0_i32_0 = arith.constant 0 : i32
    %c0_i32_1 = arith.constant 0 : i32
    return %c0_i32, %c0_i32_0 : i32, i32
  }
  func.func @transform_8(%arg0: i32, %arg1: i32) -> (i32, i32) {
    %c0_i32 = arith.constant 0 : i32
    %c0_i32_0 = arith.constant 0 : i32
    %c0_i32_1 = arith.constant 0 : i32
    return %c0_i32, %c0_i32_0 : i32, i32
  }
  func.func @transform_9(%arg0: i32, %arg1: i32) -> (i32, i32, i32) {
    %c0_i32 = arith.constant 0 : i32
    %c0_i32_0 = arith.constant 0 : i32
    return %arg0, %arg1, %c0_i32 : i32, i32, i32
  }
  func.func @transform_10(%arg0: i32, %arg1: i32) -> (i32, i32, i32, i32) {
    %c0_i32 = arith.constant 0 : i32
    %c0_i32_0 = arith.constant 0 : i32
    %c0_i32_1 = arith.constant 0 : i32
    return %arg0, %c0_i32, %arg1, %c0_i32_0 : i32, i32, i32, i32
  }
}

</mosaic_0001>

<bundles_post_ra>
// kernel: tpu_custom_call.1
= control target key start
LH: loop header
LB: loop body
LE: loop exit
PB: predicated region body
PF: predicated region fallthrough
CT: control target
= control target key end

     0   :  { %s2067_s0 = inlined_call_operand.hbm [shape: f32[2,8,32], index: 0, kind: input, shape index: {}]   ;;  %s2068_s1 = inlined_call_operand.hbm [shape: bf16[2,8,32], index: 1, kind: input, shape index: {}]   ;;  %s2069_s2 = inlined_call_operand.hbm [shape: bf16[2,8,8], index: 2, kind: input, shape index: {}]   ;;  %s2070_s3 = inlined_call_operand.hbm [shape: bf16[32,32], index: 3, kind: input, shape index: {}]   ;;  %s2071_s4 = inlined_call_operand.hbm [shape: bf16[32,64], index: 4, kind: input, shape index: {}]   ;;  %s2072_s5 = inlined_call_operand.hbm [shape: bf16[32,32], index: 5, kind: input, shape index: {}]   ;;  %s2073_s6 = inlined_call_operand.vmem [shape: f32[1,32], index: 6, kind: input, shape index: {}]   ;;  %s2074_s7 = inlined_call_operand.vmem [shape: f32[1,32], index: 7, kind: input, shape index: {}]   ;;  %s2075_s8 = inlined_call_operand.vmem [shape: f32[1,32], index: 8, kind: input, shape index: {}]   ;;  %s2076_s9 = inlined_call_operand.hbm [shape: f32[2,8,32], index: 9, kind: output, shape index: {0}]   ;;  %s2077_s10 = inlined_call_operand.hbm [shape: bf16[2,4,8,8], index: 10, kind: output, shape index: {1}]  }
   0x1   :  { %2091 = sst [smem:[#allocation30_spill]] %s2068_s1 }
   0x2   :  { %2092 = sst [smem:[#allocation31_spill]] %s2069_s2 }
   0x3   :  { %2093 = sst [smem:[#allocation32_spill]] %s2070_s3 }
   0x4   :  { %2094 = sst [smem:[#allocation33_spill]] %s2071_s4 }
   0x5   :  { %2095 = sst [smem:[#allocation34_spill]] %s2072_s5 }
   0x6   :  { %2096 = sst [smem:[#allocation35_spill]] %s2073_s6 }
   0x7   :  { %2097 = sst [smem:[#allocation36_spill]] %s2076_s9 }
   0x8   :  { %2098 = sst [smem:[#allocation37_spill]] %s2077_s10 }
   0x9   :  { %16 = vsyncpa [#allocation5], 0 }
   0xa   :  { %18 = vsyncpa [#allocation5 + $0x1], 0 }
   0xb   :  { %19 = vsyncpa [#allocation8], 0 }
   0xc   :  { %21 = vsyncpa [#allocation8 + $0x1], 0 }
   0xd   :  { %22 = vsyncpa [#allocation11], 0 }
   0xe   :  { %23 = vsyncpa [#allocation14], 0 }
   0xf   :  { %24 = vsyncpa [#allocation6], 0 }
  0x10   :  { %26 = vsyncpa [#allocation6 + $0x1], 0 }
  0x11   :  { %27 = vsyncpa [#allocation17], 0 }
  0x12   :  { %29 = vsyncpa [#allocation17 + $0x1], 0  ;;  %s1771_s13 = smov 0   ;;  %s1773_s14 = smov 0  }
  0x13   :  { %s1775_s15 = smov 0   ;;  %s1777_s16 = smov 0  }
  0x14   :  { %s1779_s17 = smov 0   ;;  %s1781_s18 = smov 0  }
  0x15 LB: > { %2099 = sst [smem:[#allocation24_spill]] %s1679_s13  ;;  %s1802_s19 = sadd.s32 4294967295, %s1699_s18   ;;  %s1699_s18 = sphi %s1781_s18, %s35_s18   ;;  %s1695_s17 = sphi %s1779_s17, %s2132_s17   ;;  %s1691_s16 = sphi %s1777_s16, %s2131_s16   ;;  %s1687_s15 = sphi %s1775_s15, %s2127_s15   ;;  %s1683_s14 = sphi %s1773_s14, %s2130_s14   ;;  %s1679_s13 = sphi %s1771_s13, %s2129_s13  }
  0x16   : > { %2100 = sst [smem:[#allocation25_spill]] %s1687_s15  ;;  %p1181_p0 = scmp.ge.s32.totalorder %s1699_s18, 1 }
  0x17   : > { %2101 = sst [smem:[#allocation26_spill]] %s1699_s18  ;;  %p70_p1 = scmp.eq.s32.totalorder %s1802_s19, 0 }
  0x18   : > { %p316_p2 = scmp.lt.s32.totalorder %s1699_s18, 3  ;;  %s2102_s3 = sld [smem:[#allocation32_spill]] }
  0x19   : > { %s1701_s24 = smov [#allocation10]   ;;  %s2078_s27 = smov 64  }
  0x1a   : > { %p1810_p3 = pnand %p1181_p0, %p316_p2  ;;  %s329_s25 = sshll.u32 %s1701_s24, 4  ;;  %s330_s25 = int_to_ptr.vmem [resolvable:$true] %s329_s25 }
  0x1b   : > { %s2080_s28 = smov 4   ;;  %s1180_s29 = sadd.s32 4294967294, %s1699_s18  }
  0x1c   : > { %p1272_p4 = pneg %p1810_p3  ;;  %s47_s30 = sadd.s32 1, %s1695_s17 }
  0x1d   : > { %s56_s11 = sadd.s32 1, %s1687_s15  ;;  %p49_p7 = scmp.ge.s32.totalorder %s47_s30, 2 }
  0x1e   : > { %s327_s22 = sshll.u32 %s2102_s3, 4  ;;  %p1818_p5 = pnand %p1272_p4, %p70_p1  ;;  %s328_s22 = int_to_ptr.hbm [resolvable:$true] %s327_s22 }
  0x1f   : > { %p63_p8 = scmp.ne.s32.totalorder %s1687_s15, %s1683_s14  ;;  %p64_p9 = scmp.eq.s32.totalorder %s1699_s18, 0 }
  0x20   : > { %1275 = dma.hbm_to_vmem [thread:$0]  (!%p1818_p5), %s328_s22, 256, %s330_s25, [#allocation11], %s2078_s27, %s2078_s27, %s2080_s28  }
  0x21   : > { %p69_p10 = scmp.ne.s32.totalorder %s1683_s14, %s1679_s13  ;;  %s2134_s30 = smov (%p49_p7, %s47_s30), 0 }
  0x22   : > { %2105 = sst [smem:[#allocation27_spill]] %s2134_s30  ;;  %p65_p11 = por %p64_p9, %p63_p8 }
  0x23   : > { %p1840_p12 = por %p70_p1, %p69_p10  ;;  %s51_s20 = ssub.s32 %s1695_s17, %s2134_s30 }
  0x24   : > { %p275_p13 = scmp.eq.s32.totalorder %s1802_s19, 1  ;;  %p54_p0 = scmp.eq.s32.totalorder %s51_s20, 0 }
  0x25   : > { %p281_p2 = scmp.eq.s32.totalorder %s1180_s29, 1  ;;  %p1302_p6 = scmp.lt.s32.totalorder %s1699_s18, 2 }
  0x26   : > { %p1847_p4 = por %p275_p13, %p63_p8  ;;  %s1860_s25 = sand.u32 1, %s1687_s15  }
  0x27   : > { %s1853_s22 = scalar_select %p54_p0, %s1687_s15, %s56_s11  }
  0x28   : > { %p1855_p7 = por %p281_p2, %p69_p10  ;;  %p1862_p9 = pnand %p1302_p6, %p65_p11 }
  0x29   : > { %2108 = sst [smem:[#allocation28_spill]] %s1853_s22  ;;  %s400_s29 = sand.u32 1, %s1699_s18  }
  0x2a   : > { %s2109_s24 = scalar_select %p1855_p7, 1, 0 }
  0x2b   : > { %s2089_s20 = sshll.u32 %s1860_s25, 2  ;;  %s1189_s28 = sshll.u32 %s1695_s17, 2 }
  0x2c   : > { %2110 = sst [smem:[#allocation29_spill]] %s2109_s24  ;;  %s404_s11 = scalar_lea.vmem [#allocation7], %s2089_s20 }
  0x2d   : > { %s412_s3 = sshll.u32 %s404_s11, 4  ;;  %s2112_s1 = sld [smem:[#allocation30_spill]]  ;;  %s413_s3 = int_to_ptr.vmem [resolvable:$true] %s412_s3 }
  0x2e   : > { %s2113_s2 = sld [smem:[#allocation31_spill]]  ;;  %s1877_s18 = scalar_lea.sflag [#allocation8], %s400_s29 }
  0x2f   : > { %s2114_s4 = sld [smem:[#allocation33_spill]]  ;;  %s1704_s22 = smov [#allocation12]  }
  0x30   : > { %s2115_s5 = sld [smem:[#allocation34_spill]]  ;;  %s2116_s13 = smov 4  }
  0x31   : > { %s1186_s29 = sshll.u32 %s1860_s25, 3  ;;  %s2118_s26 = sshll.u32 %s1860_s25, 2 }
  0x33   : > { %s408_s24 = scalar_lea.hbm %s2112_s1, %s1189_s28  ;;  %s1187_s1 = sshll.u32 %s1695_s17, 3 }
  0x34   : > { %s410_s15 = sshll.u32 %s408_s24, 4  ;;  %s428_s6 = scalar_lea.hbm %s2113_s2, %s1189_s28  ;;  %s411_s15 = int_to_ptr.hbm [resolvable:$true] %s410_s15 }
  0x35   : > { %1288 = dma.hbm_to_vmem [thread:$0]  (!%p1862_p9), %s411_s15, 64, %s413_s3, %s1877_s18  }
  0x36   : > { %s341_s30 = sshll.u32 %s2114_s4, 4  ;;  %s343_s24 = sshll.u32 %s1704_s22, 4  ;;  %s342_s30 = int_to_ptr.hbm [resolvable:$true] %s341_s30  ;;  %s344_s24 = int_to_ptr.vmem [resolvable:$true] %s343_s24 }
  0x37   : > { %s355_s9 = sshll.u32 %s2115_s5, 4  ;;  %s2117_s28 = smov 64   ;;  %s356_s9 = int_to_ptr.hbm [resolvable:$true] %s355_s9 }
  0x38   : > { %1278 = dma.hbm_to_vmem [thread:$0]  (!%p1818_p5), %s342_s30, 256, %s344_s24, [#allocation11], %s2117_s28, %s2117_s28, %s2116_s13  }
  0x39   : > { %s1705_s3 = smov [#allocation13]   ;;  %s389_s11 = scalar_lea.hbm %s2067_s0, %s1187_s1 }
  0x3a   : > { %s357_s15 = sshll.u32 %s1705_s3, 4  ;;  %s384_s30 = scalar_lea.vmem [#allocation4], %s1186_s29  ;;  %s358_s15 = int_to_ptr.vmem [resolvable:$true] %s357_s15 }
  0x3b   : > { %1281 = dma.hbm_to_vmem [thread:$0]  (!%p1818_p5), %s356_s9, 256, %s358_s15, [#allocation14], %s2117_s28, %s2117_s28, %s2116_s13  }
  0x3c   : > { %s393_s22 = sshll.u32 %s384_s30, 4  ;;  %s391_s24 = sshll.u32 %s389_s11, 4  ;;  %s394_s22 = int_to_ptr.vmem [resolvable:$true] %s393_s22  ;;  %s392_s24 = int_to_ptr.hbm [resolvable:$true] %s391_s24 }
  0x3d   : > { %s430_s3 = sshll.u32 %s428_s6, 4  ;;  %s381_s2 = scalar_lea.sflag [#allocation5], %s1860_s25  ;;  %s431_s3 = int_to_ptr.hbm [resolvable:$true] %s430_s3 }
  0x3e   : > { %1285 = dma.hbm_to_vmem [thread:$0]  (!%p1862_p9), %s392_s24, 128, %s394_s22, %s381_s2  }
  0x3f   : > { %s423_s4 = scalar_lea.vmem [#allocation9], %s2118_s26  ;;  %441 = sbr.rel (%p1810_p3) target bundleno = 1371 (0x55b), region = 56 }
  0x40   : > { %s432_s5 = sshll.u32 %s423_s4, 4  ;;  %s1914_s9 = sand.u32 (!%p1810_p3), 1, %s1683_s14   ;;  %s433_s5 = int_to_ptr.vmem [resolvable:$true] %s432_s5 }
  0x41   : > { %1291 = dma.hbm_to_vmem [thread:$0]  (!%p1862_p9), %s431_s3, 64, %s433_s5, %s1877_s18  }
  0x42   : > { %s1193_s6 = sshll.u32 (!%p1810_p3), %s1914_s9, 3  ;;  %s444_s13 = scalar_lea.sflag (!%p1810_p3), [#allocation5], %s1914_s9 }
  0x43   : > { %s447_s2 = scalar_lea.vmem (!%p1810_p3), [#allocation4], %s1193_s6 }
  0x44   : > { %1654 = dma.done.wait (%p1840_p12), %s444_s13, 128  }
  0x45   : > { %1656 = vsyncadd (%p1840_p12), %s444_s13, 4294967168  ;;  %s453_s4 = sand.u32 1, %s1802_s19   ;;  %s1194_s5 = sshll.u32 %s1914_s9, 2 }
  0x46   : > { %s454_s18 = scalar_lea.sflag [#allocation8], %s453_s4  ;;  %s1926_s23 = scalar_lea.vmem [#allocation7], %s1194_s5 }
  0x47   : > { %1658 = dma.done.wait (%p1840_p12), %s454_s18, 128  }
  0x48   : > { %1660 = vsyncadd (%p1840_p12), %s454_s18, 4294967168  ;;  %s1932_s27 = scalar_lea.vmem [#allocation9], %s1194_s5 }
  0x49   : > { %1662 = dma.done.wait (%p70_p1), [#allocation11], 512  }
  0x4a   : > { %1664 = vsyncadd (%p70_p1), [#allocation11], 4294966784 }
  0x4b   : > { %1666 = dma.done.wait (%p70_p1), [#allocation14], 256  }
  0x4c   : > { %1668 = vsyncadd (%p70_p1), [#allocation14], 4294967040  ;;  %vm557_vm0 = vcmask 261120   ;;  %v1942_v0 = vld [vmem:[%s447_s2] sm:$0xff]  ;;  %v1706_v2 = vmov 32.0   ;;  %v1244_v14 = vld [vmem:[#allocation12 + $0x8] sm:$0xff] }
  0x4d   : > { %v584_v1 = vsel %vm557_vm0, %v1942_v0, 0.0  ;;  %1373 = vrcp.f32 %v1706_v2  ;;  %567 = vmatpush.bf16.msra.mxu0 %v1244_v14  ;;  %v1243_v15 = vld [vmem:[#allocation12] sm:$0xff]  ;;  %v1246_v17 = vld [vmem:[#allocation10 + $0x8] sm:$0xff]  ;;  %v1245_v18 = vld [vmem:[#allocation10] sm:$0xff]  ;;  %vm575_vm5 = vcmask 257024   ;;  %vm688_vm6 = vcmask 64512  }
  0x4e   : > { %585 = vadd.xlane.f32.xlu0 %v584_v1  ;;  %v540_v16 = vld [vmem:[%s1926_s23] sm:$0xf]  ;;  %649 = vmatpush.bf16.msra.mxu1 %v1246_v17  ;;  %v1370_v28 = vld [vmem:[%s2074_s7] ss:$0 sm:$0xff]  ;;  %s1707_s15 = smov 120   ;;  %s1708_s29 = smov 112  }
  0x4f   : > { %v1371_v31 = vld [vmem:[%s2075_s8] ss:$0 sm:$0xff]  ;;  %s1709_s1 = smov 104   ;;  %s1710_s10 = smov 96   ;;  %vm821_vm7 = vcmask 1043456   ;;  %vm813_vm8 = vcmask 60416  }
  0x50   : > { %v686_v57 = vld [vmem:[%s1932_s27] sm:$0xf]  ;;  %s1200_s20 = sshll.u32 %s1914_s9, 4  ;;  %s1711_s30 = smov 16   ;;  %vm908_vm9 = vcmask 130048   ;;  %vm910_vm10 = vcmask 195584  }
  0x51   : > { %568 = vmatpush.bf16.msra.mxu0 %v1243_v15  ;;  %v687_v58 = vunpack.c.l.bf16 %v686_v57  ;;  %s1989_s11 = scalar_lea.vmem [#allocation16], %s1200_s20  ;;  %s1712_s22 = smov 8  }
  0x52   : > { %650 = vmatpush.bf16.msra.mxu1 %v1245_v18  ;;  %s1713_s24 = smov 24   ;;  %s1249_s3 = sshll.u32 %s1691_s16, 4 }
  0x53   : > { %v1374_v3 = vpop.eup %1373  ;;  %s2119_s2 = sld [smem:[#allocation37_spill]]  ;;  %s985_s5 = sshll.u32 %s1989_s11, 4  ;;  %s986_s5 = int_to_ptr.vmem [resolvable:$true] %s985_s5 }
  0x54   : > { %v588_v4 = vmul.f32 32.0, %v1374_v3  ;;  %vm592_vm1 = vweird.f32 %v1374_v3  ;;  %1209 = vmatmul.msk.bf16.vlgmr.msra.gmra.mxu0 %vm557_vm0, %v540_v16  ;;  %s957_s23 = scalar_lea.sflag [#allocation17], %s1914_s9 }
  0x56   : > { %v589_v5 = vsub.f32 1.0, %v588_v4 }
  0x58   : > { %v590_v6 = vmul.f32 %v1374_v3, %v589_v5 }
  0x59   : > { %s984_s4 = scalar_lea.hbm %s2119_s2, %s1249_s3  ;;  %s1593_s28 = scalar_lea.hbm %s2119_s2, 32 }
  0x5a   : > { %v591_v7 = vadd.f32 %v1374_v3, %v590_v6  ;;  %s987_s18 = sshll.u32 %s984_s4, 4  ;;  %s988_s18 = int_to_ptr.hbm [resolvable:$true] %s987_s18 }
  0x5b   : > { %s1587_s27 = sshra.s32 %s988_s18, 4  ;;  %s1588_s27 = int_to_ptr.hbm [resolvable:$true] %s1587_s27 }
  0x5c   : > { %v593_v8 = vsel %vm592_vm1, %v1374_v3, %v591_v7  ;;  %s1589_s19 = scalar_lea.hbm %s1588_s27, 16  ;;  %p1594_p6 = scmp.lt.s32.totalorder %s1588_s27, %s2119_s2 }
  0x5d   : > { %p1590_p1 = scmp.ne.s32.totalorder %s1588_s27, %s1589_s19  ;;  %p1595_p8 = scmp.lt.s32.totalorder %s1593_s28, %s1589_s19 }
  0x5f   : > { %p1591_p3 = pnand %p1590_p1, %p1847_p4  ;;  %p1596_p10 = por %p1595_p8, %p1594_p6 }
  0x61   : > { %p1592_p5 = pneg %p1591_p3 }
  0x63   : > { %p1597_p11 = pnand %p1596_p10, %p1592_p5 }
  0xc1   : > { %v586_v9 = vpop.xlane.xlu0 %585 }
  0xc2   : > { %v594_v10 = vmul.f32 %v593_v8, %v586_v9 }
  0xc4   : > { %v595_v11 = vsub.f32 %v1942_v0, %v594_v10 }
  0xc6   : > { %v596_v12 = vmul.f32 %v595_v11, %v595_v11 }
  0xc8   : > { %v597_v13 = vsel %vm557_vm0, %v596_v12, 0.0 }
  0xc9   : > { %598 = vadd.xlane.f32.xlu0 %v597_v13 }
  0xd1   : > { %v570_v35 = vpop.f32.mrf.mxu0 }
  0xd2   : > { %v574_v36 = vpack.c.bf16 %v570_v35, %v570_v35 }
  0xd4   : > { %576 = vst.msk [vmem:[#allocation2] sm:$0xf] %vm575_vm5, %v574_v36 }
  0xd9   : > { %v572_v37 = vpop.f32.mrf.mxu0 }
  0xdb   : > { %v656_v38 = vld [vmem:[#allocation2] sm:$0xf] }
  0xdc   : > { %673 = vrot.lane.b32.xlu1 %v656_v38, %s1707_s15  ;;  %675 = vrot.lane.b32.xlu2 %v656_v38, %s1708_s29  ;;  %v693_v39 = vsel %vm688_vm6, %v656_v38, 0 }
  0xdd   : > { %702 = vmatpush.bf16.xpose.msra.mxu2 %v693_v39 }
  0xe4   : > { %677 = vrot.lane.b32.xlu2 %v656_v38, %s1709_s1 }
 0x136   : > { %v676_v43 = vpop.permute.xlu2 %675 }
 0x137   : > { %v731_v44 = vsel %vm688_vm6, %v676_v43, 0 }
 0x138   : > { %740 = vmatpush.bf16.xpose.msrb.mxu0 %v731_v44 }
 0x13c   : > { %v599_v19 = vpop.xlane.xlu0 %598 }
 0x13d   : > { %v600_v20 = vmul.f32 %v599_v19, %v593_v8 }
 0x13e   : > { %v678_v45 = vpop.permute.xlu2 %677 }
 0x13f   : > { %v601_v21 = vadd.f32 1e-06, %v600_v20  ;;  %v750_v46 = vsel %vm688_vm6, %v678_v45, 0 }
 0x140   : > { %759 = vmatpush.bf16.xpose.msrb.mxu1 %v750_v46 }
 0x141   : > { %1375 = vrsqrt.f32 %v601_v21  ;;  %vm608_vm3 = vweird.f32 %v601_v21 }
 0x147   : > { %v1376_v22 = vpop.eup %1375 }
 0x148   : > { %v603_v23 = vmul.f32 %v1376_v22, %v601_v21  ;;  %vm609_vm2 = vweird.f32 %v1376_v22 }
 0x149   : > { %vm610_vm4 = vmor %vm608_vm3, %vm609_vm2 }
 0x14a   : > { %v604_v24 = vmul.f32 %v1376_v22, %v603_v23 }
 0x14c   : > { %v605_v25 = vmul.f32 0.5, %v604_v24 }
 0x14e   : > { %v606_v26 = vsub.f32 1.5, %v605_v25  ;;  %v674_v47 = vpop.permute.xlu1 %673 }
 0x14f   : > { %v712_v48 = vsel %vm688_vm6, %v674_v47, 0 }
 0x150   : > { %v607_v27 = vmul.f32 %v1376_v22, %v606_v26  ;;  %721 = vmatpush.bf16.xpose.msra.mxu3 %v712_v48 }
 0x152   : > { %v611_v29 = vsel %vm610_vm4, %v1376_v22, %v607_v27 }
 0x153   : > { %v612_v30 = vmul.f32 %v611_v29, %v595_v11 }
 0x155   : > { %v617_v32 = vmul.f32 %v1370_v28, %v612_v30 }
 0x157   : > { %v622_v33 = vadd.f32 %v1371_v31, %v617_v32 }
 0x159   : > { %v623_v34 = vpack.c.bf16 %v622_v33, %v622_v33 }
 0x15b   : > { %1218 = vmatmul.msk.bf16.vlgmr.msra.gmra.mxu1 %vm557_vm0, %v623_v34 }
 0x1d8   : > { %v652_v40 = vpop.f32.mrf.mxu1 }
 0x1d9   : > { %662 = vrot.lane.b32.xlu0 %v652_v40, %s1708_s29  ;;  %659 = vrot.lane.b32.xlu1 %v652_v40, %s1707_s15  ;;  %v668_v41 = vpack.c.bf16 %v652_v40, %v652_v40 }
 0x1db   : > { %1219 = vmatmul.msk.bf16.vlgmr.msra.gmra.mxu2 %vm688_vm6, %v668_v41 }
 0x1e0   : > { %v654_v42 = vpop.f32.mrf.mxu1 }
 0x1e1   : > { %665 = vrot.lane.b32.xlu1 %v652_v40, %s1709_s1 }
 0x24b   : > { %v663_v49 = vpop.permute.xlu0 %662  ;;  %v660_v50 = vpop.permute.xlu1 %659 }
 0x24c   : > { %v670_v51 = vpack.c.bf16 %v663_v49, %v663_v49  ;;  %v669_v52 = vpack.c.bf16 %v660_v50, %v660_v50 }
 0x24e   : > { %1220 = vmatmul.msk.bf16.vlgmr.msra.gmra.mxu3 %vm688_vm6, %v669_v52  ;;  %1221 = vmatmul.msk.bf16.vlgmr.msrb.gmra.mxu0 %vm688_vm6, %v670_v51 }
 0x253   : > { %v666_v53 = vpop.permute.xlu1 %665 }
 0x254   : > { %v671_v54 = vpack.c.bf16 %v666_v53, %v666_v53 }
 0x256   : > { %1222 = vmatmul.msk.bf16.vlgmr.msrb.gmra.mxu1 %vm688_vm6, %v671_v54 }
 0x25e   : > { %v704_v55 = vpop.f32.mrf.mxu2 }
 0x25f   : > { %v705_v63 = vadd.f32 %v704_v55, %v687_v58 }
 0x261   : > { %v765_v7 = vsel %vm688_vm6, %v705_v63, -inf }
 0x266   : > { %v706_v56 = vpop.f32.mrf.mxu2 }
 0x2cb   : > { %v742_v59 = vpop.f32.mrf.mxu0 }
 0x2cc   : > { %v743_v60 = vadd.f32 %v742_v59, %v687_v58 }
 0x2ce   : > { %v771_v61 = vsel %vm688_vm6, %v743_v60, -inf }
 0x2cf   : > { %772 = vmax.xlane.f32.xlu1 %v771_v61 }
 0x2d1   : > { %v723_v62 = vpop.f32.mrf.mxu3 }
 0x2d2   : > { %v724_v1 = vadd.f32 %v723_v62, %v687_v58 }
 0x2d3   : > { %v744_v2 = vpop.f32.mrf.mxu0  ;;  %v761_v3 = vpop.f32.mrf.mxu1 }
 0x2d4   : > { %v762_v4 = vadd.f32 %v761_v3, %v687_v58  ;;  %v768_v5 = vsel %vm688_vm6, %v724_v1, -inf }
 0x2d5   : > { %769 = vmax.xlane.f32.xlu2 %v768_v5 }
 0x2d6   : > { %v774_v6 = vsel %vm688_vm6, %v762_v4, -inf }
 0x2d7   : > { %775 = vmax.xlane.f32.xlu0 %v774_v6  ;;  %766 = vmax.xlane.f32.xlu1 %v765_v7 }
 0x2d9   : > { %v725_v8 = vpop.f32.mrf.mxu3 }
 0x2db   : > { %v763_v9 = vpop.f32.mrf.mxu1 }
 0x2ed   : > { %578 = vrot.lane.b32.xlu2 %v574_v36, %s1710_s10 }
 0x342   : > { %v773_v10 = vpop.xlane.xlu1 %772 }
 0x343   : > { %v779_v11 = vsub.f32 %v743_v60, %v773_v10 }
 0x345   : > { %v785_v12 = vmul.f32 1.442695, %v779_v11 }
 0x347   : > { %1377 = vpow2.f32 %v785_v12 }
 0x348   : > { %v770_v13 = vpop.xlane.xlu2 %769 }
 0x349   : > { %v778_v14 = vsub.f32 %v724_v1, %v770_v13  ;;  %v1247_v1 = vld [vmem:[#allocation13] sm:$0xff] }
 0x34a   : > { %v776_v15 = vpop.xlane.xlu0 %775  ;;  %v767_v21 = vpop.xlane.xlu1 %766 }
 0x34b   : > { %v783_v16 = vmul.f32 1.442695, %v778_v14  ;;  %v780_v17 = vsub.f32 %v762_v4, %v776_v15  ;;  %v777_v24 = vsub.f32 %v705_v63, %v767_v21  ;;  %v1248_v63 = vld [vmem:[#allocation13 + $0x8] sm:$0xff] }
 0x34d   : > { %v1378_v18 = vpop.eup %1377  ;;  %1379 = vpow2.f32 %v783_v16  ;;  %v787_v20 = vmul.f32 1.442695, %v780_v17  ;;  %v781_v26 = vmul.f32 1.442695, %v777_v24 }
 0x34e   : > { %v795_v19 = vsel %vm688_vm6, %v1378_v18, 0.0 }
 0x34f   : > { %796 = vadd.xlane.f32.xlu0 %v795_v19  ;;  %1381 = vpow2.f32 %v787_v20 }
 0x350   : > { %v579_v22 = vpop.permute.xlu2 %578  ;;  %1383 = vpow2.f32 %v781_v26 }
 0x351   : > { %581 = vst.msk [vmem:[#allocation3] sm:$0xf] %vm575_vm5, %v579_v22 }
 0x353   : > { %v1380_v23 = vpop.eup %1379 }
 0x354   : > { %v792_v25 = vsel %vm688_vm6, %v1380_v23, 0.0 }
 0x355   : > { %793 = vadd.xlane.f32.xlu1 %v792_v25  ;;  %v1382_v28 = vpop.eup %1381 }
 0x356   : > { %v798_v30 = vsel %vm688_vm6, %v1382_v28, 0.0  ;;  %v1384_v31 = vpop.eup %1383 }
 0x357   : > { %v789_v32 = vsel %vm688_vm6, %v1384_v31, 0.0 }
 0x358   : > { %v657_v27 = vld [vmem:[#allocation3] sm:$0xf] }
 0x359   : > { %680 = vrot.lane.b32.xlu2 %v657_v27, %s1707_s15  ;;  %v823_v29 = vsel %vm821_vm7, %v657_v27, 0 }
 0x35a   : > { %832 = vmatpush.bf16.msrb.mxu2 %v823_v29 }
 0x35d   : > { %799 = vadd.xlane.f32.xlu1 %v798_v30 }
 0x35e   : > { %942 = vmatpush.bf16.msra.mxu2 %v1248_v63 }
 0x361   : > { %684 = vrot.lane.b32.xlu2 %v657_v27, %s1709_s1 }
 0x362   : > { %943 = vmatpush.bf16.msra.mxu2 %v1247_v1 }
 0x363   : > { %682 = vrot.lane.b32.xlu0 %v657_v27, %s1708_s29 }
 0x365   : > { %790 = vadd.xlane.f32.xlu1 %v789_v32 }
 0x3b3   : > { %v681_v33 = vpop.permute.xlu2 %680 }
 0x3b4   : > { %v842_v34 = vsel %vm821_vm7, %v681_v33, 0 }
 0x3b5   : > { %851 = vmatpush.bf16.msrb.mxu3 %v842_v34 }
 0x3bb   : > { %v685_v35 = vpop.permute.xlu2 %684 }
 0x3bc   : > { %v880_v36 = vsel %vm821_vm7, %v685_v35, 0 }
 0x3bd   : > { %889 = vmatpush.bf16.msra.mxu1 %v880_v36 }
 0x3c2   : > { %v797_v37 = vpop.xlane.xlu0 %796 }
 0x3c3   : > { %1385 = vrcp.f32 %v797_v37 }
 0x3c8   : > { %v794_v38 = vpop.xlane.xlu1 %793 }
 0x3c9   : > { %v1386_v39 = vpop.eup %1385  ;;  %1387 = vrcp.f32 %v794_v38 }
 0x3ca   : > { %v807_v40 = vmul.f32 %v1386_v39, %v1378_v18 }
 0x3cc   : > { %v811_v41 = vpack.c.bf16 %v807_v40, %v807_v40 }
 0x3ce   : > { %816 = vst.msk [vmem:[%s1989_s11 + $0x8] sm:$0xf] %vm813_vm8, %v811_v41 }
 0x3cf   : > { %v1388_v42 = vpop.eup %1387 }
 0x3d0   : > { %v806_v43 = vmul.f32 %v1388_v42, %v1380_v23  ;;  %v800_v44 = vpop.xlane.xlu1 %799 }
 0x3d1   : > { %1389 = vrcp.f32 %v800_v44 }
 0x3d2   : > { %v810_v45 = vpack.c.bf16 %v806_v43, %v806_v43 }
 0x3d4   : > { %815 = vst.msk [vmem:[%s1989_s11 + $0x4] sm:$0xf] %vm813_vm8, %v810_v45  ;;  %1224 = vmatmul.msk.bf16.vlgmr.msrb.gmra.mxu3 %vm688_vm6, %v810_v45 }
 0x3d5   : > { %v683_v46 = vpop.permute.xlu0 %682 }
 0x3d6   : > { %v861_v47 = vsel %vm821_vm7, %v683_v46, 0 }
 0x3d7   : > { %v1390_v48 = vpop.eup %1389  ;;  %870 = vmatpush.bf16.msra.mxu0 %v861_v47 }
 0x3d8   : > { %v808_v49 = vmul.f32 %v1390_v48, %v1382_v28  ;;  %v791_v50 = vpop.xlane.xlu1 %790 }
 0x3d9   : > { %1391 = vrcp.f32 %v791_v50 }
 0x3da   : > { %v812_v51 = vpack.c.bf16 %v808_v49, %v808_v49  ;;  %1225 = vmatmul.msk.bf16.vlgmr.msra.gmra.mxu0 %vm688_vm6, %v811_v41 }
 0x3dc   : > { %817 = vst.msk [vmem:[%s1989_s11 + $0xc] sm:$0xf] %vm813_vm8, %v812_v51  ;;  %1226 = vmatmul.msk.bf16.vlgmr.msra.gmra.mxu1 %vm688_vm6, %v812_v51 }
 0x3df   : > { %v1392_v52 = vpop.eup %1391 }
 0x3e0   : > { %v805_v53 = vmul.f32 %v1392_v52, %v1384_v31 }
 0x3e2   : > { %v809_v54 = vpack.c.bf16 %v805_v53, %v805_v53 }
 0x3e4   : > { %814 = vst.msk [vmem:[%s1989_s11] sm:$0xf] %vm813_vm8, %v809_v54  ;;  %1223 = vmatmul.msk.bf16.vlgmr.msrb.gmra.mxu2 %vm688_vm6, %v809_v54 }
 0x457   : > { %v853_v55 = vpop.f32.mrf.mxu3  ;;  %v872_v56 = vpop.f32.mrf.mxu0 }
 0x458   : > { %900 = vrot.lane.b32.xlu1 %v872_v56, %s1711_s30  ;;  %896 = vrot.lane.b32.xlu2 %v853_v55, %s1712_s22 }
 0x459   : > { %v891_v57 = vpop.f32.mrf.mxu1 }
 0x45f   : > { %v855_v58 = vpop.f32.mrf.mxu3  ;;  %v874_v59 = vpop.f32.mrf.mxu0 }
 0x460   : > { %904 = vrot.lane.b32.xlu2 %v891_v57, %s1713_s24 }
 0x461   : > { %v893_v60 = vpop.f32.mrf.mxu1 }
 0x467   : > { %v834_v61 = vpop.f32.mrf.mxu2 }
 0x46f   : > { %v836_v62 = vpop.f32.mrf.mxu2 }
 0x4b2   : > { %v897_v2 = vpop.permute.xlu2 %896 }
 0x4b3   : > { %v907_v3 = vsel %vm688_vm6, %v834_v61, %v897_v2 }
 0x4ba   : > { %v905_v5 = vpop.permute.xlu2 %904 }
 0x4ca   : > { %v901_v4 = vpop.permute.xlu1 %900 }
 0x4cb   : > { %v909_v6 = vsel %vm908_vm9, %v907_v3, %v901_v4 }
 0x4cc   : > { %v911_v7 = vsel %vm910_vm10, %v909_v6, %v905_v5 }
 0x4cd   : > { %v912_v8 = vpack.c.bf16 %v911_v7, %v911_v7 }
 0x4cf   : > { %1235 = vmatmul.msk.bf16.vlgmr.msra.gmra.mxu2 %vm557_vm0, %v912_v8 }
 0x4d0   : > { %1600 = shalt.err (!%p1597_p11)
}
 0x4d1   : > { %s1714_s1 = smov 64   ;;  %s1715_s10 = smov 4  }
 0x4d2   : > { %1269 = dma.vmem_to_hbm [thread:$0]  (%p1847_p4), %s986_s5, 256, %s988_s18, %s957_s23, %s1714_s1, %s1714_s1, %s1715_s10  }
 0x4d3   : > { %s1238_s20 = sshll.u32 %s1691_s16, 3  ;;  %s2120_s22 = sld [smem:[#allocation35_spill]] }
 0x4d4   : > { %s2121_s26 = sld [smem:[#allocation36_spill]]  ;;  %s527_s4 = scalar_lea.vmem [#allocation15], %s1193_s6 }
 0x4d5   : > { %s970_s27 = sshll.u32 %s527_s4, 4  ;;  %s952_s16 = scalar_lea.sflag [#allocation6], %s1914_s9  ;;  %s971_s27 = int_to_ptr.vmem [resolvable:$true] %s970_s27 }
 0x4d9   : > { %v1372_v9 = vld [vmem:[%s2120_s22] ss:$0 sm:$0xff] }
 0x4da   : > { %s968_s13 = scalar_lea.hbm %s2121_s26, %s1238_s20  ;;  %s1621_s6 = scalar_lea.hbm %s2121_s26, 16 }
 0x4db   : > { %s972_s19 = sshll.u32 %s968_s13, 4  ;;  %s973_s19 = int_to_ptr.hbm [resolvable:$true] %s972_s19 }
 0x4dc   : > { %s1615_s5 = sshra.s32 %s973_s19, 4  ;;  %s1616_s5 = int_to_ptr.hbm [resolvable:$true] %s1615_s5 }
 0x4dd   : > { %s1617_s18 = scalar_lea.hbm %s1616_s5, 8  ;;  %p1622_p2 = scmp.lt.s32.totalorder %s1616_s5, %s2121_s26 }
 0x4de   : > { %p1618_p12 = scmp.ne.s32.totalorder %s1616_s5, %s1617_s18  ;;  %p1623_p9 = scmp.lt.s32.totalorder %s1621_s6, %s1617_s18 }
 0x4e0   : > { %p1619_p13 = pnand %p1618_p12, %p1847_p4  ;;  %p1624_p1 = por %p1623_p9, %p1622_p2 }
 0x4e2   : > { %p1620_p0 = pneg %p1619_p13 }
 0x4e4   : > { %p1625_p3 = pnand %p1624_p1, %p1620_p0 }
 0x552   : > { %v945_v10 = vpop.f32.mrf.mxu2 }
 0x553   : > { %v946_v11 = vadd.f32 %v1372_v9, %v945_v10 }
 0x555   : > { %v949_v12 = vadd.f32 %v946_v11, %v1942_v0 }
 0x557   : > { %950 = vst.msk [vmem:[%s527_s4] sm:$0xff] %vm557_vm0, %v949_v12 }
 0x558   : > { %1628 = shalt.err (!%p1625_p3)
}
 0x559   : > { %1268 = dma.vmem_to_hbm [thread:$0]  (%p1847_p4), %s971_s27, 128, %s973_s19, %s952_s16  }
 0x55a   : > { %v947_v0 = vpop.f32.mrf.mxu2 }
 0x55b PF: > { %s2122_s9 = sld [smem:[#allocation24_spill]] }
 0x55c   : > { %s2124_s29 = sld [smem:[#allocation26_spill]] }
 0x561   : > { %s1002_s1 = sand.u32 1, %s2122_s9  }
 0x562   : > { %p2125_p5 = scmp.ge.s32.totalorder %s2124_s29, 2  ;;  %s1003_s10 = scalar_lea.sflag [#allocation6], %s1002_s1 }
 0x564   : > { %p1293_p6 = pnand %p2125_p5, %p1855_p7 }
 0x566   : > { %p1294_p8 = pneg %p1293_p6 }
 0x568   : > { %1670 = dma.done.wait (%p1294_p8), %s1003_s10, 128  }
 0x569   : > { %1672 = vsyncadd (%p1294_p8), %s1003_s10, 4294967168  ;;  %s1013_s20 = scalar_lea.sflag [#allocation17], %s1002_s1 }
 0x56a   : > { %1674 = dma.done.wait (%p1294_p8), %s1013_s20, 256  }
 0x56b   : > { %1676 = vsyncadd (%p1294_p8), %s1013_s20, 4294967040  ;;  %s35_s18 = sadd.s32 1, %s2124_s29   ;;  %s2126_s21 = sld [smem:[#allocation25_spill]] }
 0x56c   : > { %p32_p10 = scmp.ge.s32.totalorder %s35_s18, 4   ;;  %s2127_s15 = sld [smem:[#allocation28_spill]] }
 0x56d   : > { %s2128_s11 = sld [smem:[#allocation27_spill]]  ;;  %s2129_s13 = smov %s1683_s14 }
 0x56e   : > { %s2131_s16 = smov %s1695_s17 }
 0x56f   :  { %34 = sbr.rel (!%p32_p10) target bundleno = 21 (0x15), region = 158 }
 0x571   : > { %s2130_s14 = smov %s2126_s21 }
 0x573   : > { %s2132_s17 = smov %s2128_s11 }
 0x574   :  { %1019 = vsyncpa [#allocation5], 1 }
 0x575   :  { %1021 = vsyncpa [#allocation5 + $0x1], 1 }
 0x576   :  { %1022 = vsyncpa [#allocation8], 1 }
 0x577   :  { %1024 = vsyncpa [#allocation8 + $0x1], 1 }
 0x578   :  { %1025 = vsyncpa [#allocation11], 1 }
 0x579   :  { %1026 = vsyncpa [#allocation14], 1 }
 0x57a   :  { %1027 = vsyncpa [#allocation6], 1 }
 0x57b   :  { %1029 = vsyncpa [#allocation6 + $0x1], 1 }
 0x57c   :  { %1030 = vsyncpa [#allocation17], 1 }
 0x57d   :  { %1032 = vsyncpa [#allocation17 + $0x1], 1 }

</bundles_post_ra>
